<compile_context>
chip_gen: v6e
topology: v6e:2x2x1
jax: 0.10.0
libtpu: 0.0.40
codegen_flags: <defaults>
</compile_context>

<pallas_src>
import jax
import jax.numpy as jnp
from jax.experimental import pallas as pl
from jax.experimental.pallas import tpu as pltpu


def _round_up(a, b):
    return ((a + b - 1) // b) * b


# ---------------------------------------------------------------------------
# one GATConv + BatchNorm(eval) + ReLU layer, row-tiled over destination nodes
# ---------------------------------------------------------------------------

def gat_layer_kernel(x_all_ref, x_dst_ref, mask_ref, w_ref, prm_ref, out_ref):
    # x_all_ref : [Np, HE] f32   all node features (resident; HE = H+1, col H == 1)
    # x_dst_ref : [TM, HE] f32   this tile's destination-node rows
    # mask_ref  : [TM, Np] int8  adjacency rows: 1 iff edge j->i (self loops incl.)
    # w_ref     : [HE, HE] f32   block-diag extended lin weight (h = x_ext @ w_ext)
    # prm_ref   : [4, HE]  f32   rows: att_src | v_dst (= att_dst @ W^T) | scale | shift
    # out_ref   : [TM, HE] f32
    x_all = x_all_ref[...]
    w = w_ref[...]
    prm = prm_ref[...]
    att_src = prm[0:1, :]
    v_dst = prm[1:2, :]
    bn_scale = prm[2:3, :]
    bn_shift = prm[3:4, :]

    # Source-side projection for the whole graph.  Recomputed per row tile:
    # O(Np*HE^2) per tile is hidden under the O(TM*Np) exp (EUP) bottleneck at
    # HE ~ 33, and staying f32 keeps the softmax logits exact.
    h = jnp.dot(x_all, w, preferred_element_type=jnp.float32)            # [Np, HE]

    # Attention logits via MXU contractions on the feature axis (no transpose,
    # no cross-lane sums).  a_dst uses the host-folded v_dst = att_dst @ W^T so
    # only this tile's x rows are needed.
    a_src = jax.lax.dot_general(att_src, h, (((1,), (1,)), ((), ())),
                                preferred_element_type=jnp.float32)      # [1, Np]
    a_dst = jax.lax.dot_general(x_dst_ref[...], v_dst, (((1,), (1,)), ((), ())),
                                preferred_element_type=jnp.float32)      # [TM, 1]

    e = a_dst + a_src                                                     # [TM, Np]
    e = jnp.maximum(e, 0.2 * e)              # LeakyReLU(0.2): vmul + vmax, no select
    neighbor = mask_ref[...].astype(jnp.float32)       # int8 stream, not an f32 bias
    e = jnp.where(neighbor > 0.0, e, -1e30)

    # Masked row softmax with deferred normalisation.  Every real row has a
    # self loop; exp(-1e30 - e_max) underflows to exactly 0.
    e_max = jnp.max(e, axis=1, keepdims=True)                             # [TM, 1]
    p = jnp.exp(e - e_max)                                                # [TM, Np]

    # Aggregation on the bf16 MXU fast path (f32 accumulation).  h's last
    # column is exactly 1, so agg[:, -1] is the softmax denominator: the
    # row-sum is folded into the matmul instead of a second XLU reduce.
    agg = jnp.dot(p.astype(jnp.bfloat16), h.astype(jnp.bfloat16),
                  preferred_element_type=jnp.float32)                     # [TM, HE]
    denom = agg[:, -1:]                                                   # [TM, 1]
    inv = pl.reciprocal(denom, approx=True)                               # EUP vrcp

    # Fused: softmax normalisation, GAT bias + BatchNorm(eval) scale/shift, ReLU.
    # scale[-1]=0 / shift[-1]=1 keep the ones column exactly 1 for the next layer.
    y = agg * inv * bn_scale + bn_shift
    out_ref[...] = jnp.maximum(y, 0.0)


def homo_gnn_forward(x, adj, params, *, tile_rows=256):
    """HomoGNN.forward (eval): returns (last_x, None).

    x      : [N, H] f32 node features
    adj    : [N, N] dense adjacency, adj[i, j] != 0 iff edge j -> i (self loops incl.)
    params : list of per-layer tuples (w, att_src, att_dst, bias, gamma, beta, mean, var)
    """
    N, H = x.shape
    HE = H + 1

    # Row-tile choice (default 256: multiple of 128, v5e MXU friendly); pad N up
    # to a tile multiple.  Padded rows/cols are fully masked and sliced off.
    if N <= tile_rows:
        TM, Np = N, N
    else:
        TM = tile_rows
        Np = _round_up(N, TM)

    # ---- host-side packing / folding (layer-invariant work) ----
    x_ext = jnp.concatenate([x, jnp.ones((N, 1), jnp.float32)], axis=1)    # [N, HE]
    x_ext = jnp.pad(x_ext, ((0, Np - N), (0, 0)))
    mask = jnp.pad((adj > 0).astype(jnp.int8), ((0, Np - N), (0, Np - N)))

    w_list, prm_list = [], []
    for (w, att_src, att_dst, bias, gamma, beta, mean, var) in params:
        w_ext = jnp.zeros((HE, HE), jnp.float32).at[:H, :H].set(w).at[H, H].set(1.0)
        zero = jnp.zeros((1, 1), jnp.float32)
        one = jnp.ones((1, 1), jnp.float32)
        att_src_e = jnp.concatenate([att_src, zero], axis=1)
        att_dst_e = jnp.concatenate([att_dst, zero], axis=1)
        v_dst = att_dst_e @ w_ext.T                    # a_dst = x_ext @ v_dst^T
        scale = gamma * jax.lax.rsqrt(var + 1e-12)     # BatchNorm1d eps=1e-12 (module)
        shift = (bias - mean) * scale + beta           # fold GAT bias into BN shift
        scale_e = jnp.concatenate([scale, zero], axis=1)  # 0 -> ones column untouched
        shift_e = jnp.concatenate([shift, one], axis=1)   # ... stays exactly 1
        w_list.append(w_ext)
        prm_list.append(jnp.concatenate([att_src_e, v_dst, scale_e, shift_e], axis=0))

    # VMEM budget: actual tile footprint (+ double buffering) with margin,
    # instead of relying on the default scoped limit (16/32 MiB).
    f32 = 4
    vmem_est = (
        2 * Np * HE * f32              # x_all (pipeline allocates 2 buffers)
        + 2 * TM * HE * f32            # x_dst
        + 2 * TM * Np * 1              # int8 mask rows (streamed)
        + 2 * (HE * HE + 8 * HE) * f32  # w, prm
        + 2 * TM * HE * f32            # out
        + Np * HE * (f32 + 2)          # h (f32 + bf16 copy)
        + TM * Np * (2 * f32 + 2)      # e / p (f32) + p (bf16)
        + 4 * TM * HE * f32            # agg / y / temporaries
    )
    vmem_limit = int(min(max(vmem_est * 3 // 2, 32 * 1024 * 1024), 110 * 1024 * 1024))

    layer_call = pl.pallas_call(
        gat_layer_kernel,
        out_shape=jax.ShapeDtypeStruct((Np, HE), jnp.float32),
        grid=(Np // TM,),
        in_specs=[
            pl.BlockSpec((Np, HE), lambda i: (0, 0)),   # x_all: resident across tiles
            pl.BlockSpec((TM, HE), lambda i: (i, 0)),   # destination rows of x
            pl.BlockSpec((TM, Np), lambda i: (i, 0)),   # int8 adjacency rows (streamed)
            pl.BlockSpec((HE, HE), lambda i: (0, 0)),   # extended lin weight
            pl.BlockSpec((4, HE), lambda i: (0, 0)),    # packed per-channel params
        ],
        out_specs=pl.BlockSpec((TM, HE), lambda i: (i, 0)),
        compiler_params=pltpu.CompilerParams(
            dimension_semantics=("parallel",),          # v7x: split row tiles over 2 TCs
            vmem_limit_bytes=vmem_limit,
        ),
    )

    cur = x_ext
    for l in range(len(params)):
        cur = layer_call(cur, cur, mask, w_list[l], prm_list[l])
    return cur[:N, :H], None


# ---------------------------------------------------------------------------
# deterministic synthetic parameter / input construction + pure-JAX reference
# ---------------------------------------------------------------------------

def glorot(key, shape):
    fan_in, fan_out = shape[-2], shape[-1]
    limit = (6.0 / (fan_in + fan_out)) ** 0.5
    return jax.random.uniform(key, shape, jnp.float32, -limit, limit)


def make_params(key, hidden, num_layers):
    params = []
    for _ in range(num_layers):
        key, k_w, k_as, k_ad, k_b, k_g, k_be, k_m, k_v = jax.random.split(key, 9)
        w = glorot(k_w, (hidden, hidden))                 # lin.weight^T: h = x @ w
        att_src = glorot(k_as, (1, hidden))
        att_dst = glorot(k_ad, (1, hidden))
        bias = 0.1 * jax.random.normal(k_b, (1, hidden), jnp.float32)
        gamma = jax.random.uniform(k_g, (1, hidden), jnp.float32, 0.5, 1.5)
        beta = 0.1 * jax.random.normal(k_be, (1, hidden), jnp.float32)
        mean = 0.1 * jax.random.normal(k_m, (1, hidden), jnp.float32)
        var = jax.random.uniform(k_v, (1, hidden), jnp.float32, 0.5, 1.5)
        params.append((w, att_src, att_dst, bias, gamma, beta, mean, var))
    return params


def make_adjacency(key, n_nodes, n_edges):
    """Dense mask adj[i, j] = 1 iff edge j -> i; self loops always present
    (mirrors GATConv's internal remove_self_loops + add_self_loops)."""
    k_src, k_dst = jax.random.split(key)
    src = jax.random.randint(k_src, (n_edges,), 0, n_nodes)
    dst = jax.random.randint(k_dst, (n_edges,), 0, n_nodes)
    adj = jnp.zeros((n_nodes, n_nodes), jnp.float32)
    adj = adj.at[dst, src].set(1.0)
    adj = adj * (1.0 - jnp.eye(n_nodes, dtype=jnp.float32))   # remove self loops
    adj = adj + jnp.eye(n_nodes, dtype=jnp.float32)           # add self loops
    return adj


def reference_layer(x, adj, layer_params):
    """Pure-JAX (f32) reference of one GATConv + BN(eval) + ReLU layer."""
    w, att_src, att_dst, bias, gamma, beta, mean, var = layer_params
    h = x @ w
    a_src = jnp.sum(h * att_src, axis=-1, keepdims=True)
    a_dst = jnp.sum(h * att_dst, axis=-1, keepdims=True)
    e = a_dst + a_src.T
    e = jnp.where(e >= 0, e, 0.2 * e)
    e = jnp.where(adj > 0, e, -jnp.inf)
    attn = jax.nn.softmax(e, axis=1)
    out = attn @ h + bias
    y = (out - mean) / jnp.sqrt(var + 1e-12) * gamma + beta
    return jnp.maximum(y, 0.0)


if __name__ == "__main__":
    N_NODES = 60        # graph nodes (deliberately not a multiple of the row tile)
    HIDDEN = 32         # config.gnn_hidden_channel
    NUM_LAYERS = 2      # config.gnn_num_layer
    N_EDGES = 180
    TILE_ROWS = 32      # small on purpose so the multi-tile row grid + padding run

    key = jax.random.PRNGKey(0)
    k_x, k_adj, k_p = jax.random.split(key, 3)

    x = jax.random.normal(k_x, (N_NODES, HIDDEN), jnp.float32)
    adj = make_adjacency(k_adj, N_NODES, N_EDGES)
    params = make_params(k_p, HIDDEN, NUM_LAYERS)

    out, attn_w = homo_gnn_forward(x, adj, params, tile_rows=TILE_ROWS)
    out = jax.block_until_ready(out)

    # correctness vs pure-JAX f32 reference; tolerance accounts for the bf16
    # aggregation operands and the approx reciprocal (softmax chain stays f32).
    ref = x
    for lp in params:
        ref = reference_layer(ref, adj, lp)
    assert attn_w is None
    assert out.shape == ref.shape
    max_err = float(jnp.max(jnp.abs(out - ref)))
    assert jnp.allclose(out, ref, atol=5e-2, rtol=5e-2), \
        f"mismatch vs reference (max abs err {max_err:.2e})"
    print("KERNEL_OK")
</pallas_src>

<mosaic_0001>
module attributes {stable_mosaic.version = 11 : i64} {
  func.func @gat_layer_kernel(%arg0: i32, %arg1: memref<64x33xf32, #tpu.memory_space<vmem>>, %arg2: memref<32x33xf32, #tpu.memory_space<vmem>>, %arg3: memref<32x64xi8, #tpu.memory_space<vmem>>, %arg4: memref<33x33xf32, #tpu.memory_space<vmem>>, %arg5: memref<4x33xf32, #tpu.memory_space<vmem>>, %arg6: memref<32x33xf32, #tpu.memory_space<vmem>>) attributes {dimension_semantics = [#tpu.dimension_semantics<parallel>], iteration_bounds = array<i64: 2>, scalar_prefetch = 0 : i64, scratch_operands = 0 : i64, tpu.core_type = #tpu.core_type<tc>, window_params = [{pipeline_mode = #tpu.pipeline_mode<synchronous>, transform_indices = @transform_0, window_bounds = array<i64: 64, 33>}, {transform_indices = @transform_1, window_bounds = array<i64: 32, 33>}, {transform_indices = @transform_2, window_bounds = array<i64: 32, 64>}, {pipeline_mode = #tpu.pipeline_mode<synchronous>, transform_indices = @transform_3, window_bounds = array<i64: 33, 33>}, {pipeline_mode = #tpu.pipeline_mode<synchronous>, transform_indices = @transform_4, window_bounds = array<i64: 4, 33>}, {transform_indices = @transform_5, window_bounds = array<i64: 32, 33>}]} {
    %c0 = arith.constant 0 : index
    %c0_0 = arith.constant 0 : index
    %0 = vector.load %arg1[%c0, %c0_0] : memref<64x33xf32, #tpu.memory_space<vmem>>, vector<64x33xf32>
    %c0_1 = arith.constant 0 : index
    %c0_2 = arith.constant 0 : index
    %1 = vector.load %arg4[%c0_1, %c0_2] : memref<33x33xf32, #tpu.memory_space<vmem>>, vector<33x33xf32>
    %c0_3 = arith.constant 0 : index
    %c0_4 = arith.constant 0 : index
    %2 = vector.load %arg5[%c0_3, %c0_4] : memref<4x33xf32, #tpu.memory_space<vmem>>, vector<4x33xf32>
    %3 = vector.extract_strided_slice %2 {offsets = [0, 0], sizes = [1, 33], strides = [1, 1]} : vector<4x33xf32> to vector<1x33xf32>
    %4 = vector.extract_strided_slice %2 {offsets = [1, 0], sizes = [1, 33], strides = [1, 1]} : vector<4x33xf32> to vector<1x33xf32>
    %5 = vector.extract_strided_slice %2 {offsets = [2, 0], sizes = [1, 33], strides = [1, 1]} : vector<4x33xf32> to vector<1x33xf32>
    %6 = vector.extract_strided_slice %2 {offsets = [3, 0], sizes = [1, 33], strides = [1, 1]} : vector<4x33xf32> to vector<1x33xf32>
    %cst = arith.constant dense<0.000000e+00> : vector<64x33xf32>
    %7 = tpu.matmul %0, %1, %cst {dimension_numbers = #tpu.dot_dimension_numbers<[1], [0], [0], [1], [0, 0, 1, 1], [], []>} : vector<64x33xf32>, vector<33x33xf32>, vector<64x33xf32> -> vector<64x33xf32>
    %cst_5 = arith.constant dense<0.000000e+00> : vector<1x64xf32>
    %8 = tpu.matmul %3, %7, %cst_5 {dimension_numbers = #tpu.dot_dimension_numbers<[1], [1], [0], [0], [0, 0, 1, 0], [], []>} : vector<1x33xf32>, vector<64x33xf32>, vector<1x64xf32> -> vector<1x64xf32>
    %c0_6 = arith.constant 0 : index
    %c0_7 = arith.constant 0 : index
    %9 = vector.load %arg2[%c0_6, %c0_7] : memref<32x33xf32, #tpu.memory_space<vmem>>, vector<32x33xf32>
    %cst_8 = arith.constant dense<0.000000e+00> : vector<32x1xf32>
    %10 = tpu.matmul %9, %4, %cst_8 {dimension_numbers = #tpu.dot_dimension_numbers<[1], [1], [0], [0], [0, 0, 1, 0], [], []>} : vector<32x33xf32>, vector<1x33xf32>, vector<32x1xf32> -> vector<32x1xf32>
    %11 = vector.broadcast %10 : vector<32x1xf32> to vector<32x64xf32>
    %12 = vector.broadcast %8 : vector<1x64xf32> to vector<32x64xf32>
    %13 = arith.addf %11, %12 : vector<32x64xf32>
    %cst_9 = arith.constant 2.000000e-01 : f32
    %14 = vector.broadcast %cst_9 : f32 to vector<32x64xf32>
    %15 = arith.mulf %14, %13 : vector<32x64xf32>
    %16 = arith.maximumf %13, %15 : vector<32x64xf32>
    %c0_10 = arith.constant 0 : index
    %c0_11 = arith.constant 0 : index
    %17 = vector.load %arg3[%c0_10, %c0_11] : memref<32x64xi8, #tpu.memory_space<vmem>>, vector<32x64xi8>
    %18 = arith.sitofp %17 : vector<32x64xi8> to vector<32x64xf32>
    %cst_12 = arith.constant 0.000000e+00 : f32
    %19 = vector.broadcast %cst_12 : f32 to vector<32x64xf32>
    %20 = arith.cmpf ogt, %18, %19 : vector<32x64xf32>
    %cst_13 = arith.constant -1.000000e+30 : f32
    %21 = vector.broadcast %cst_13 : f32 to vector<32x64xf32>
    %22 = arith.select %20, %16, %21 : vector<32x64xi1>, vector<32x64xf32>
    %cst_14 = arith.constant dense<0xFF800000> : vector<32xf32>
    %23 = vector.multi_reduction <maximumf>, %22, %cst_14 [1] : vector<32x64xf32> to vector<32xf32>
    %24 = vector.shape_cast %23 : vector<32xf32> to vector<32x1xf32>
    %25 = vector.broadcast %24 : vector<32x1xf32> to vector<32x64xf32>
    %26 = arith.subf %22, %25 : vector<32x64xf32>
    %27 = math.exp %26 : vector<32x64xf32>
    %28 = arith.truncf %27 : vector<32x64xf32> to vector<32x64xbf16>
    %29 = arith.truncf %7 : vector<64x33xf32> to vector<64x33xbf16>
    %cst_15 = arith.constant dense<0.000000e+00> : vector<32x33xf32>
    %30 = tpu.matmul %28, %29, %cst_15 {dimension_numbers = #tpu.dot_dimension_numbers<[1], [0], [0], [1], [0, 0, 1, 1], [], []>} : vector<32x64xbf16>, vector<64x33xbf16>, vector<32x33xf32> -> vector<32x33xf32>
    %31 = vector.extract_strided_slice %30 {offsets = [0, 32], sizes = [32, 1], strides = [1, 1]} : vector<32x33xf32> to vector<32x1xf32>
    %32 = tpu.reciprocal %31 {approx = true} : vector<32x1xf32> -> vector<32x1xf32>
    %33 = vector.broadcast %32 : vector<32x1xf32> to vector<32x33xf32>
    %34 = arith.mulf %30, %33 : vector<32x33xf32>
    %35 = vector.broadcast %5 : vector<1x33xf32> to vector<32x33xf32>
    %36 = arith.mulf %34, %35 : vector<32x33xf32>
    %37 = vector.broadcast %6 : vector<1x33xf32> to vector<32x33xf32>
    %38 = arith.addf %36, %37 : vector<32x33xf32>
    %cst_16 = arith.constant 0.000000e+00 : f32
    %39 = vector.broadcast %cst_16 : f32 to vector<32x33xf32>
    %40 = arith.maximumf %38, %39 : vector<32x33xf32>
    %c0_17 = arith.constant 0 : index
    %c0_18 = arith.constant 0 : index
    %41 = vector.load %arg6[%c0_17, %c0_18] : memref<32x33xf32, #tpu.memory_space<vmem>>, vector<32x33xf32>
    tpu.vector_store %arg6[%c0_17, %c0_18], %40 {strides = array<i32>} : memref<32x33xf32, #tpu.memory_space<vmem>>, vector<32x33xf32>,
    return
  }
  func.func @transform_0(%arg0: i32) -> (i32, i32) {
    %c0_i32 = arith.constant 0 : i32
    %c0_i32_0 = arith.constant 0 : i32
    %c0_i32_1 = arith.constant 0 : i32
    return %c0_i32, %c0_i32_0 : i32, i32
  }
  func.func @transform_1(%arg0: i32) -> (i32, i32) {
    %c0_i32 = arith.constant 0 : i32
    %c0_i32_0 = arith.constant 0 : i32
    return %arg0, %c0_i32 : i32, i32
  }
  func.func @transform_2(%arg0: i32) -> (i32, i32) {
    %c0_i32 = arith.constant 0 : i32
    %c0_i32_0 = arith.constant 0 : i32
    return %arg0, %c0_i32 : i32, i32
  }
  func.func @transform_3(%arg0: i32) -> (i32, i32) {
    %c0_i32 = arith.constant 0 : i32
    %c0_i32_0 = arith.constant 0 : i32
    %c0_i32_1 = arith.constant 0 : i32
    return %c0_i32, %c0_i32_0 : i32, i32
  }
  func.func @transform_4(%arg0: i32) -> (i32, i32) {
    %c0_i32 = arith.constant 0 : i32
    %c0_i32_0 = arith.constant 0 : i32
    %c0_i32_1 = arith.constant 0 : i32
    return %c0_i32, %c0_i32_0 : i32, i32
  }
  func.func @transform_5(%arg0: i32) -> (i32, i32) {
    %c0_i32 = arith.constant 0 : i32
    %c0_i32_0 = arith.constant 0 : i32
    return %arg0, %c0_i32 : i32, i32
  }
}

</mosaic_0001>

<bundles_post_ra>
// kernel: tpu_custom_call.1
= control target key start
LH: loop header
LB: loop body
LE: loop exit
PB: predicated region body
PF: predicated region fallthrough
CT: control target
= control target key end

     0   :  { %s937_s18 = smov 0   ;;  %s1063_s0 = inlined_call_operand.vmem [shape: f32[64,33], index: 0, kind: input, shape index: {}]   ;;  %s1064_s1 = inlined_call_operand.vmem [shape: f32[64,33], index: 1, kind: input, shape index: {}]   ;;  %s1065_s2 = inlined_call_operand.vmem [shape: s8[64,64], index: 2, kind: input, shape index: {}]   ;;  %s1066_s3 = inlined_call_operand.vmem [shape: f32[33,33], index: 3, kind: input, shape index: {}]   ;;  %s1067_s4 = inlined_call_operand.vmem [shape: f32[4,33], index: 4, kind: input, shape index: {}]   ;;  %s1068_s5 = inlined_call_operand.vmem [shape: f32[64,33], index: 5, kind: output, shape index: {}]  }
   0x1 LB: > { %s943_s19 = sadd.s32 4294967295, %s902_s18   ;;  %p758_p0 = scmp.ge.s32.totalorder %s902_s18, 1  ;;  %s902_s18 = sphi %s937_s18, %s15_s18  }
   0x2   : > { %p197_p1 = scmp.lt.s32.totalorder %s902_s18, 3 }
   0x4   : > { %p198_p2 = pnand %p758_p0, %p197_p1 }
   0x5   : > { %s759_s23 = sshll.u32 (!%p198_p2), %s943_s19, 2  ;;  %p235_p4 = scmp.lt.s32.totalorder (!%p198_p2), %s943_s19, 1 }
   0x6   : > { %201 = sbr.rel (%p198_p2) target bundleno = 974 (0x3ce), region = 40  ;;  %p230_p3 = scmp.lt.s32.totalorder (!%p198_p2), %s759_s23, 7 }
   0xb   : > { %v258_v0 = vld [vmem:[%s1066_s3 + $0x20] sm:$0x1]  ;;  %vm285_vm0 = vcmask 1040384   ;;  %v257_v1 = vld [vmem:[%s1066_s3 + $0x18] sm:$0xff]  ;;  %vm260_vm1 = vcmask 269312   ;;  %v256_v3 = vld [vmem:[%s1066_s3 + $0x10] sm:$0xff]  ;;  %v495_v14 = vlaneseq }
   0xc   : > { %814 = vmatprep.subr.msk.mxu0 %vm285_vm0, %v258_v0  ;;  %v246_v2 = vld [vmem:[%s1063_s0] sm:$0xff]  ;;  %v255_v4 = vld [vmem:[%s1066_s3 + $0x8] sm:$0xff]  ;;  %v248_v7 = vld [vmem:[%s1063_s0 + $0x10] sm:$0xff]  ;;  %v904_v13 = vmov 0.0   ;;  %vm905_vm2 = vmmov 0   ;;  %s1070_s23 = smov (!%p230_p3, %s759_s23), 7 }
   0xd   : > { %815 = vmatpush3.msk.msra.mxu0 %vm285_vm0, %v258_v0  ;;  %824 = vmatprep.mubr.msk.f32.mxu0 %vm260_vm1, %v246_v2  ;;  %v254_v5 = vld [vmem:[%s1066_s3] sm:$0xff]  ;;  %v247_v6 = vld [vmem:[%s1063_s0 + $0x8] sm:$0xff]  ;;  %v249_v8 = vld [vmem:[%s1063_s0 + $0x18] sm:$0xff]  ;;  %v997_v15 = vshrl.u32 %v495_v14, 7  ;;  %s760_s26 = sshll.u32 %s1070_s23, 3  ;;  %s1072_s19 = smov (!%p235_p4, %s943_s19), 1 }
   0xe   : > { %816 = vmatprep.subr.mxu0 %v257_v1  ;;  %v250_v9 = vld [vmem:[%s1063_s0 + $0x20] sm:$0xff]  ;;  %v251_v10 = vld [vmem:[%s1063_s0 + $0x28] sm:$0xff]  ;;  %v252_v11 = vld [vmem:[%s1063_s0 + $0x30] sm:$0xff]  ;;  %836 = vmatprep.subr.mxu1 %v904_v13  ;;  %s233_s29 = scalar_lea.vmem %s1064_s1, %s760_s26  ;;  %s761_s30 = sshll.u32 %s1072_s19, 3  ;;  %vm548_vm5 = vcmask 523264  }
   0xf   : > { %817 = vmatpush3.msra.mxu0 %v257_v1  ;;  %v253_v12 = vld [vmem:[%s1063_s0 + $0x38] sm:$0xff]  ;;  %852 = vmatprep.mubr.msk.f32.mxu1 %vm905_vm2, %v904_v13  ;;  %v497_v16 = vsub.s32 1, %v997_v15  ;;  %v1005_v17 = vld [vmem:[%s1067_s4] sm:$0xf]  ;;  %v493_v19 = vld [vmem:[%s233_s29 + $0x10] sm:$0xff]  ;;  %s238_s8 = scalar_lea.vmem %s1065_s2, %s761_s30  ;;  %v517_v46 = vsub.s32 0, %v997_v15  ;;  %s243_s10 = scalar_lea.vmem %s1068_s5, %s760_s26 }
  0x10   : > { %818 = vmatprep.subr.mxu0 %v256_v3  ;;  %v491_v20 = vld [vmem:[%s233_s29] sm:$0xff]  ;;  %v494_v21 = vld [vmem:[%s233_s29 + $0x18] sm:$0xff]  ;;  %v492_v25 = vld [vmem:[%s233_s29 + $0x8] sm:$0xff] }
  0x11   : > { %819 = vmatpush3.msra.mxu0 %v256_v3  ;;  %v498_v18 = vrot.slane %v1005_v17, %v497_v16  ;;  %v531_v45 = vld [vmem:[%s238_s8] sm:$0xff] }
  0x12   : > { %820 = vmatprep.subr.mxu0 %v255_v4  ;;  %v532_v47 = vunpack.c.0.s8 %v531_v45  ;;  %v533_v48 = vunpack.c.1.s8 %v531_v45  ;;  %v534_v52 = vunpack.c.2.s8 %v531_v45  ;;  %v535_v53 = vunpack.c.3.s8 %v531_v45 }
  0x13   : > { %821 = vmatpush3.msra.mxu0 %v255_v4  ;;  %v501_v22 = vmul.f32 %v498_v18, %v493_v19  ;;  %v499_v23 = vmul.f32 %v498_v18, %v491_v20  ;;  %v502_v24 = vmul.f32 %v498_v18, %v494_v21  ;;  %v500_v26 = vmul.f32 %v498_v18, %v492_v25 }
  0x14   : > { %822 = vmatprep.subr.mxu0 %v254_v5  ;;  %v536_v56 = vcvt.s32.f32 %v532_v47  ;;  %v537_v57 = vcvt.s32.f32 %v533_v48  ;;  %v538_v62 = vcvt.s32.f32 %v534_v52  ;;  %v539_v63 = vcvt.s32.f32 %v535_v53 }
  0x15   : > { %823 = vmatpush3.msra.mxu0 %v254_v5  ;;  %v509_v27 = vsel %vm260_vm1, %v501_v22, 0.0  ;;  %v503_v28 = vsel %vm260_vm1, %v499_v23, 0.0  ;;  %v512_v29 = vsel %vm260_vm1, %v502_v24, 0.0  ;;  %v506_v30 = vsel %vm260_vm1, %v500_v26, 0.0 }
  0x16   : > { %825 = vmatmul.mubr.msk.f32.vlgmr.msra.gmra.mxu0 %vm260_vm1, %v247_v6  ;;  %510 = vadd.xlane.f32.xlu1 %v509_v27  ;;  %vm540_vm3 = vcmp.gt.f32.partialorder %v536_v56, 0.0  ;;  %vm541_vm4 = vcmp.gt.f32.partialorder %v537_v57, 0.0  ;;  %vm542_vm6 = vcmp.gt.f32.partialorder %v538_v62, 0.0  ;;  %vm543_vm7 = vcmp.gt.f32.partialorder %v539_v63, 0.0 }
  0x17   : > { %827 = vmatprep.mubr.msk.f32.mxu0 %vm260_vm1, %v248_v7  ;;  %504 = vadd.xlane.f32.xlu0 %v503_v28  ;;  %v664_v45 = vsub.s32 2, %v997_v15  ;;  %v672_v47 = vsub.s32 3, %v997_v15 }
  0x19   : > { %v665_v48 = vrot.slane %v1005_v17, %v664_v45  ;;  %v673_v52 = vrot.slane %v1005_v17, %v672_v47 }
  0x1a   : > { %828 = vmatmul.mubr.msk.f32.gmra.mxu0 %vm260_vm1, %v249_v8  ;;  %513 = vadd.xlane.f32.xlu1 %v512_v29 }
  0x1b   : > { %830 = vmatprep.mubr.msk.f32.mxu0 %vm260_vm1, %v250_v9  ;;  %507 = vadd.xlane.f32.xlu0 %v506_v30 }
  0x1e   : > { %831 = vmatmul.mubr.msk.f32.gmra.mxu0 %vm260_vm1, %v251_v10 }
  0x1f   : > { %833 = vmatprep.mubr.msk.f32.mxu0 %vm260_vm1, %v252_v11 }
  0x22   : > { %834 = vmatmul.mubr.msk.f32.gmra.mxu0 %vm260_vm1, %v253_v12 }
  0x9f   : > { %v511_v43 = vpop.xlane.xlu1 %510 }
  0xa0   : > { %v505_v44 = vpop.xlane.xlu0 %504 }
  0xa3   : > { %v514_v49 = vpop.xlane.xlu1 %513 }
  0xa4   : > { %v508_v51 = vpop.xlane.xlu0 %507 }
  0xd6   : > { %v826_v31 = vpop.f32.mrf.mxu0 }
  0xd8   : > { %v355_v32 = vpop.f32.mrf.mxu0 }
  0xd9   : > { %v575_v42 = vpack.c.bf16 %v826_v31, %v355_v32 }
  0xda   : > { %v829_v33 = vpop.f32.mrf.mxu0 }
  0xdc   : > { %v365_v34 = vpop.f32.mrf.mxu0 }
  0xdd   : > { %v576_v41 = vpack.c.bf16 %v829_v33, %v365_v34 }
  0xde   : > { %v832_v35 = vpop.f32.mrf.mxu0 }
  0xe0   : > { %v375_v36 = vpop.f32.mrf.mxu0 }
  0xe1   : > { %v577_v40 = vpack.c.bf16 %v832_v35, %v375_v36 }
  0xe2   : > { %v835_v37 = vpop.f32.mrf.mxu0 }
  0xe3   : > { %837 = vmatpush3.xpose.msk.msra.mxu1 %vm260_vm1, %v835_v37 }
  0xe4   : > { %v385_v38 = vpop.f32.mrf.mxu0  ;;  %838 = vmatprep.subr.mxu1 %v904_v13 }
  0xe5   : > { %v578_v39 = vpack.c.bf16 %v835_v37, %v385_v38 }
  0xe7   : > { %839 = vmatpush3.xpose.msk.msra.mxu1 %vm260_vm1, %v385_v38  ;;  %855 = vmatprep.subr.bf16.mxu0 %v578_v39 }
  0xe8   : > { %856 = vmatpush3.bf16.msra.mxu0 %v578_v39  ;;  %840 = vmatprep.subr.mxu1 %v904_v13 }
  0xe9   : > { %857 = vmatprep.subr.bf16.mxu0 %v577_v40 }
  0xeb   : > { %841 = vmatpush3.xpose.msk.msra.mxu1 %vm260_vm1, %v832_v35 }
  0xec   : > { %858 = vmatpush3.bf16.msra.mxu0 %v577_v40  ;;  %842 = vmatprep.subr.mxu1 %v904_v13 }
  0xed   : > { %859 = vmatprep.subr.bf16.mxu0 %v576_v41 }
  0xef   : > { %843 = vmatpush3.xpose.msk.msra.mxu1 %vm260_vm1, %v375_v36  ;;  %v906_v36 = vmov 32  }
  0xf0   : > { %860 = vmatpush3.bf16.msra.mxu0 %v576_v41  ;;  %844 = vmatprep.subr.mxu1 %v904_v13 }
  0xf1   : > { %861 = vmatprep.subr.bf16.mxu0 %v575_v42  ;;  %879 = vset.pattern.permute.xlu1 %v906_v36 }
  0xf2   : > { %878 = vset.pattern.permute.xlu0 %v906_v36 }
  0xf3   : > { %845 = vmatpush3.xpose.msk.msra.mxu1 %vm260_vm1, %v829_v33 }
  0xf4   : > { %862 = vmatpush3.bf16.msra.mxu0 %v575_v42  ;;  %846 = vmatprep.subr.mxu1 %v904_v13 }
  0xf7   : > { %847 = vmatpush3.xpose.msk.msra.mxu1 %vm260_vm1, %v365_v34 }
  0xf8   : > { %848 = vmatprep.subr.mxu1 %v904_v13 }
  0xfb   : > { %849 = vmatpush3.xpose.msk.msra.mxu1 %vm260_vm1, %v826_v31 }
  0xfc   : > { %850 = vmatprep.subr.mxu1 %v904_v13 }
  0xff   : > { %851 = vmatpush3.xpose.msk.msra.mxu1 %vm260_vm1, %v355_v32 }
 0x102   : > { %853 = vmatmul.mubr.msk.f32.vlgmr.msra.gmra.mxu1 %vm260_vm1, %v1005_v17 }
 0x1c2   : > { %v487_v50 = vpop.f32.mrf.mxu1 }
 0x1c3   : > { %v518_v54 = vrot.slane %v487_v50, %v517_v46 }
 0x1c4   : > { %v854_v55 = vpop.f32.mrf.mxu1 }
 0x1c5   : > { %v522_v58 = vadd.f32 %v518_v54, %v514_v49  ;;  %v520_v59 = vadd.f32 %v518_v54, %v508_v51  ;;  %v519_v60 = vadd.f32 %v518_v54, %v505_v44  ;;  %v521_v61 = vadd.f32 %v518_v54, %v511_v43 }
 0x1c7   : > { %v526_v0 = vmul.f32 0.2, %v522_v58  ;;  %v524_v1 = vmul.f32 0.2, %v520_v59  ;;  %v523_v2 = vmul.f32 0.2, %v519_v60 }
 0x1c8   : > { %v525_v3 = vmul.f32 0.2, %v521_v61 }
 0x1c9   : > { %v530_v4 = vmax.f32 %v522_v58, %v526_v0  ;;  %v528_v5 = vmax.f32 %v520_v59, %v524_v1  ;;  %v527_v6 = vmax.f32 %v519_v60, %v523_v2 }
 0x1ca   : > { %v529_v7 = vmax.f32 %v521_v61, %v525_v3 }
 0x1cb   : > { %v544_v8 = vsel %vm540_vm3, %v527_v6, -1e+30  ;;  %v545_v9 = vsel %vm541_vm4, %v528_v5, -1e+30  ;;  %v547_v13 = vsel %vm543_vm7, %v530_v4, -1e+30 }
 0x1cc   : > { %v549_v10 = vsel %vm548_vm5, %v544_v8, -inf  ;;  %v552_v11 = vsel %vm548_vm5, %v545_v9, -inf  ;;  %v546_v12 = vsel %vm542_vm6, %v529_v7, -1e+30  ;;  %v558_v16 = vsel %vm548_vm5, %v547_v13, -inf }
 0x1cd   : > { %550 = vmax.xlane.f32.xlu0 %v549_v10  ;;  %553 = vmax.xlane.f32.xlu1 %v552_v11  ;;  %v555_v14 = vsel %vm548_vm5, %v546_v12, -inf }
 0x1d1   : > { %556 = vmax.xlane.f32.xlu0 %v555_v14  ;;  %559 = vmax.xlane.f32.xlu1 %v558_v16 }
 0x256   : > { %v554_v18 = vpop.xlane.xlu1 %553  ;;  %v551_v19 = vpop.xlane.xlu0 %550 }
 0x257   : > { %v562_v20 = vsub.f32 %v545_v9, %v554_v18  ;;  %v561_v21 = vsub.f32 %v544_v8, %v551_v19 }
 0x259   : > { %v567_v22 = vmul.f32 1.442695, %v562_v20  ;;  %v565_v23 = vmul.f32 1.442695, %v561_v21 }
 0x25a   : > { %v560_v24 = vpop.xlane.xlu1 %559  ;;  %v557_v25 = vpop.xlane.xlu0 %556 }
 0x25b   : > { %880 = vpow2.f32 %v567_v22  ;;  %v564_v26 = vsub.f32 %v547_v13, %v560_v24  ;;  %v563_v27 = vsub.f32 %v546_v12, %v557_v25 }
 0x25c   : > { %882 = vpow2.f32 %v565_v23 }
 0x25d   : > { %v571_v28 = vmul.f32 1.442695, %v564_v26  ;;  %v569_v29 = vmul.f32 1.442695, %v563_v27 }
 0x25f   : > { %884 = vpow2.f32 %v571_v28 }
 0x260   : > { %886 = vpow2.f32 %v569_v29 }
 0x268   : > { %v881_v30 = vpop.eup %880 }
 0x269   : > { %v883_v31 = vpop.eup %882 }
 0x26a   : > { %v573_v32 = vpack.c.bf16 %v881_v30, %v883_v31 }
 0x26c   : > { %v885_v33 = vpop.eup %884  ;;  %863 = vmatprep.mubr.msk.bf16.mxu0 %vm548_vm5, %v573_v32 }
 0x26d   : > { %v887_v34 = vpop.eup %886 }
 0x26e   : > { %v574_v35 = vpack.c.bf16 %v885_v33, %v887_v34 }
 0x270   : > { %864 = vmatmul.mubr.msk.bf16.vlgmr.msra.gmra.mxu0 %vm548_vm5, %v574_v35 }
 0x330   : > { %v865_v37 = vpop.f32.mrf.mxu0 }
 0x331   : > { %888 = vrcp.f32 %v865_v37 }
 0x332   : > { %v619_v38 = vpop.f32.mrf.mxu0 }
 0x333   : > { %890 = vrcp.f32 %v619_v38 }
 0x334   : > { %v866_v39 = vpop.f32.mrf.mxu0 }
 0x336   : > { %v622_v40 = vpop.f32.mrf.mxu0 }
 0x337   : > { %892 = vrcp.f32 %v622_v40 }
 0x338   : > { %894 = vrcp.f32 %v866_v39 }
 0x33e   : > { %v889_v41 = vpop.eup %888 }
 0x33f   : > { %650 = vperm.xlu1 %879, %v889_v41  }
 0x340   : > { %v891_v42 = vpop.eup %890 }
 0x341   : > { %640 = vperm.xlu0 %878, %v891_v42  }
 0x344   : > { %v893_v43 = vpop.eup %892 }
 0x345   : > { %645 = vperm.xlu1 %879, %v893_v43   ;;  %v895_v44 = vpop.eup %894 }
 0x349   : > { %655 = vperm.xlu1 %879, %v895_v44  }
 0x3ba   : > { %v651_v46 = vpop.permute.xlu1 %650 }
 0x3bb   : > { %v660_v49 = vmul.f32 %v865_v37, %v651_v46 }
 0x3bc   : > { %v641_v50 = vpop.permute.xlu0 %640 }
 0x3bd   : > { %v658_v51 = vmul.f32 %v641_v50, %v619_v38  ;;  %v668_v54 = vmul.f32 %v665_v48, %v660_v49 }
 0x3bf   : > { %v666_v53 = vmul.f32 %v665_v48, %v658_v51  ;;  %v676_v15 = vadd.f32 %v673_v52, %v668_v54 }
 0x3c0   : > { %v646_v55 = vpop.permute.xlu1 %645 }
 0x3c1   : > { %v674_v56 = vadd.f32 %v673_v52, %v666_v53  ;;  %v659_v57 = vmul.f32 %v646_v55, %v622_v40  ;;  %v680_v0 = vmax.f32 %v676_v15, 0.0 }
 0x3c3   : > { %v678_v58 = vmax.f32 %v674_v56, 0.0  ;;  %v667_v59 = vmul.f32 %v665_v48, %v659_v57  ;;  %684 = vst.msk [vmem:[%s243_s10 + $0x10] sm:$0xff] %vm260_vm1, %v680_v0 }
 0x3c4   : > { %v656_v60 = vpop.permute.xlu1 %655 }
 0x3c5   : > { %682 = vst.msk [vmem:[%s243_s10] sm:$0xff] %vm260_vm1, %v678_v58  ;;  %v675_v61 = vadd.f32 %v673_v52, %v667_v59  ;;  %v661_v62 = vmul.f32 %v866_v39, %v656_v60 }
 0x3c7   : > { %v679_v63 = vmax.f32 %v675_v61, 0.0  ;;  %v669_v17 = vmul.f32 %v665_v48, %v661_v62 }
 0x3c9   : > { %683 = vst.msk [vmem:[%s243_s10 + $0x8] sm:$0xff] %vm260_vm1, %v679_v63  ;;  %v677_v1 = vadd.f32 %v673_v52, %v669_v17 }
 0x3cb   : > { %v681_v2 = vmax.f32 %v677_v1, 0.0 }
 0x3cd   : > { %685 = vst.msk [vmem:[%s243_s10 + $0x18] sm:$0xff] %vm260_vm1, %v681_v2 }
 0x3ce PF: > { %s15_s18 = sadd.s32 1, %s902_s18  }
 0x3cf   : > { %p12_p5 = scmp.ge.s32.totalorder %s15_s18, 4  }
 0x3d1   :  { %14 = sbr.rel (!%p12_p5) target bundleno = 1 (0x1), region = 73 }

</bundles_post_ra>
